<compile_context>
chip_gen: v7x
topology: tpu7x:2x2x1
jax: 0.10.0
libtpu: 0.0.40
codegen_flags: <defaults>
</compile_context>

<pallas_src>
import math
import numpy as np
import jax
import jax.numpy as jnp
from jax.experimental import pallas as pl
from jax.experimental.pallas import tpu as pltpu

# ---------------- fixed sinusoidal tables (glue, plain numpy) -----------------

MONTH_SIZE, DAY_SIZE, WEEKDAY_SIZE, HOUR_SIZE = 13, 32, 7, 24
# row offsets for x columns [0]=month, [1]=day, [2]=weekday, [3]=hour
COL_OFFSETS = (0,
               MONTH_SIZE,
               MONTH_SIZE + DAY_SIZE,
               MONTH_SIZE + DAY_SIZE + WEEKDAY_SIZE)
TOTAL_VOCAB = MONTH_SIZE + DAY_SIZE + WEEKDAY_SIZE + HOUR_SIZE   # 76
VOCAB_PAD = 128                                                  # MXU / (8,128) pad
LANE = 128


def _round_up(x: int, m: int) -> int:
    return ((x + m - 1) // m) * m


def _output_cols(d_model: int) -> int:
    # Pad columns to 128 only when d_model < 128 (lane-dense stores for tiny
    # widths); otherwise emit exactly d_model columns (full-extent last dim).
    return d_model if d_model >= LANE else LANE


def fixed_embedding_table(c_in: int, d_model: int) -> np.ndarray:
    """Replicates FixedEmbedding.__init__ weight construction."""
    w = np.zeros((c_in, d_model), dtype=np.float32)
    position = np.arange(0, c_in, dtype=np.float32)[:, None]
    div_term = np.exp(np.arange(0, d_model, 2, dtype=np.float32)
                      * -(math.log(10000.0) / d_model))
    w[:, 0::2] = np.sin(position * div_term)
    w[:, 1::2] = np.cos(position * div_term)
    return w


def build_combined_table(d_model: int) -> np.ndarray:
    """(128, d_out) combined table: rows = [month|day|weekday|hour|zero-pad]."""
    d_out = _output_cols(d_model)
    table = np.zeros((VOCAB_PAD, d_out), dtype=np.float32)
    table[0:MONTH_SIZE, :d_model] = fixed_embedding_table(MONTH_SIZE, d_model)
    off = MONTH_SIZE
    table[off:off + DAY_SIZE, :d_model] = fixed_embedding_table(DAY_SIZE, d_model)
    off += DAY_SIZE
    table[off:off + WEEKDAY_SIZE, :d_model] = fixed_embedding_table(WEEKDAY_SIZE, d_model)
    off += WEEKDAY_SIZE
    table[off:off + HOUR_SIZE, :d_model] = fixed_embedding_table(HOUR_SIZE, d_model)
    return table


# ---------------- Pallas kernel ------------------------------------------------

def temporal_emb_kernel(idx_ref, table_ref, out_ref):
    # idx_ref:   (TILE, 4) int32     -- offset-adjusted [month,day,weekday,hour]
    # table_ref: (128, d_out) f32    -- combined (vocab-padded) embedding table
    # out_ref:   (TILE, d_out) f32
    idx = idx_ref[...]
    tile_rows = idx.shape[0]
    lane = jax.lax.broadcasted_iota(jnp.int32, (tile_rows, VOCAB_PAD), 1)
    # Multi-hot via boolean OR of 4 disjoint one-hot compares, single cast.
    # TODO(synk): out-of-range time features silently map into neighbor/padded
    # rows instead of raising like nn.Embedding; inputs assumed valid upstream.
    hit = lane == idx[:, 0:1]
    for f in range(1, 4):
        hit = jnp.logical_or(hit, lane == idx[:, f:f + 1])
    multi_hot = hit.astype(jnp.float32)
    # One MXU matmul == sum of the four embedding lookups.
    out_ref[...] = jnp.dot(multi_hot, table_ref[...],
                           preferred_element_type=jnp.float32)


# ---------------- wrapper ------------------------------------------------------

def _vmem_capacity_bytes() -> int:
    try:
        return int(pltpu.get_tpu_info().vmem_capacity_bytes)
    except Exception:
        return 64 * 1024 * 1024   # conservative fallback (v7x physical VMEM)


def temporal_embedding(x: jax.Array, table: jax.Array, d_model: int,
                       max_tile_rows: int = 4096) -> jax.Array:
    """x: (B, L, F>=4) integer time features. Returns (B, L, d_model) float32.

    Matches TemporalEmbedding.forward with embed_type='fixed', freq='h'
    (minute term == 0.0).
    """
    B, L, _ = x.shape
    n_rows = B * L
    d_out = table.shape[1]
    assert table.shape[0] == VOCAB_PAD and d_out == _output_cols(d_model)

    # --- explicit VMEM budget over ALL per-step buffers ------------------------
    vmem = _vmem_capacity_bytes()
    budget = min(vmem // 2, 48 << 20)                  # leave headroom on every gen
    bytes_per_row = (2 * d_out * 4                     # double-buffered output tile
                     + 2 * LANE * 4                    # double-buffered idx tile (4->128 lane pad)
                     + 3 * LANE * 4)                   # multi-hot f32 + compare temps
    fixed_bytes = 2 * VOCAB_PAD * d_out * 4 + (1 << 20)   # resident table (dbuf) + slack
    cap_rows = max(LANE, ((budget - fixed_bytes) // bytes_per_row) // LANE * LANE)
    tile_rows = max(LANE, (min(max_tile_rows, cap_rows) // LANE) * LANE)
    # Keep >= ~8 grid steps so the single "parallel" axis shards across both
    # v7x TensorCores (and keeps the writeback pipeline full).
    tile_rows = min(tile_rows, max(LANE, _round_up(pl.cdiv(n_rows, 8), LANE)))

    grid = pl.cdiv(n_rows, tile_rows)
    usage = fixed_bytes + bytes_per_row * tile_rows
    vmem_limit = max(32 << 20, min(usage + (4 << 20), vmem * 9 // 10))

    # Fold per-feature row offsets into the indices here (kernel captures no
    # array constants; also removes a per-tile VPU add).
    offsets = jnp.asarray(np.asarray(COL_OFFSETS, dtype=np.int32))
    idx = x[..., :4].astype(jnp.int32).reshape(n_rows, 4) + offsets[None, :]

    out = pl.pallas_call(
        temporal_emb_kernel,
        out_shape=jax.ShapeDtypeStruct((n_rows, d_out), jnp.float32),
        grid_spec=pltpu.PrefetchScalarGridSpec(
            num_scalar_prefetch=0,
            grid=(grid,),
            in_specs=[
                # Row tile of indices (payload tile*16 B; hidden by the pipeline).
                pl.BlockSpec((tile_rows, 4), lambda i: (i, 0)),
                # Combined table: constant block index -> fetched once, resident.
                pl.BlockSpec((VOCAB_PAD, d_out), lambda i: (0, 0)),
            ],
            out_specs=pl.BlockSpec((tile_rows, d_out), lambda i: (i, 0)),
        ),
        compiler_params=pltpu.CompilerParams(
            dimension_semantics=("parallel",),
            vmem_limit_bytes=int(vmem_limit)),
    )(idx, table)

    if d_out != d_model:                 # only when d_model < 128
        out = out[:, :d_model]
    return out.reshape(B, L, d_model)


# ---------------- reference (pure numpy) for sanity check ---------------------

def temporal_embedding_ref(x: np.ndarray, d_model: int) -> np.ndarray:
    month_w = fixed_embedding_table(MONTH_SIZE, d_model)
    day_w = fixed_embedding_table(DAY_SIZE, d_model)
    weekday_w = fixed_embedding_table(WEEKDAY_SIZE, d_model)
    hour_w = fixed_embedding_table(HOUR_SIZE, d_model)
    month_x = month_w[x[:, :, 0]]
    day_x = day_w[x[:, :, 1]]
    weekday_x = weekday_w[x[:, :, 2]]
    hour_x = hour_w[x[:, :, 3]]
    return hour_x + weekday_x + day_x + month_x   # + 0.0 (no minute embed, freq='h')


# ---------------- main ---------------------------------------------------------

if __name__ == "__main__":
    B, L, d_model = 2, 8, 32
    key = jax.random.PRNGKey(0)
    k0, k1, k2, k3 = jax.random.split(key, 4)
    # x columns: [month, day, weekday, hour, minute] (minute unused, freq='h')
    month = jax.random.randint(k0, (B, L, 1), 0, MONTH_SIZE)
    day = jax.random.randint(k1, (B, L, 1), 0, DAY_SIZE)
    weekday = jax.random.randint(k2, (B, L, 1), 0, WEEKDAY_SIZE)
    hour = jax.random.randint(k3, (B, L, 1), 0, HOUR_SIZE)
    minute = jnp.zeros((B, L, 1), dtype=jnp.int32)
    x = jnp.concatenate([month, day, weekday, hour, minute], axis=-1)   # (2, 8, 5)

    table = jnp.asarray(build_combined_table(d_model))                  # (128, 128)

    out = jax.block_until_ready(temporal_embedding(x, table, d_model))
    ref = temporal_embedding_ref(np.asarray(x), d_model)

    assert out.shape == (B, L, d_model)
    # Tolerance covers possible bf16-pass MXU emulation of the f32 matmul on
    # real hardware (table entries are O(1) sinusoids); interpret mode is exact.
    err = float(np.max(np.abs(np.asarray(out) - ref)))
    assert np.allclose(np.asarray(out), ref, atol=1e-2, rtol=1e-2), err

    print("KERNEL_OK")
</pallas_src>

<mosaic_0001>
module attributes {stable_mosaic.version = 11 : i64} {
  func.func @temporal_emb_kernel(%arg0: i32, %arg1: memref<128x4xi32, #tpu.memory_space<vmem>>, %arg2: memref<128x128xf32, #tpu.memory_space<vmem>>, %arg3: memref<128x128xf32, #tpu.memory_space<vmem>>) attributes {dimension_semantics = [#tpu.dimension_semantics<parallel>], iteration_bounds = array<i64: 1>, scalar_prefetch = 0 : i64, scratch_operands = 0 : i64, tpu.core_type = #tpu.core_type<tc>, window_params = [{transform_indices = @transform_0, window_bounds = array<i64: 128, 4>}, {pipeline_mode = #tpu.pipeline_mode<synchronous>, transform_indices = @transform_1, window_bounds = array<i64: 128, 128>}, {transform_indices = @transform_2, window_bounds = array<i64: 128, 128>}]} {
    %c0 = arith.constant 0 : index
    %c0_0 = arith.constant 0 : index
    %0 = vector.load %arg1[%c0, %c0_0] : memref<128x4xi32, #tpu.memory_space<vmem>>, vector<128x4xi32>
    %1 = tpu.iota {dimensions = array<i32: 1>} : vector<128x128xi32>
    %2 = vector.extract_strided_slice %0 {offsets = [0, 0], sizes = [128, 1], strides = [1, 1]} : vector<128x4xi32> to vector<128x1xi32>
    %3 = vector.broadcast %2 : vector<128x1xi32> to vector<128x128xi32>
    %4 = arith.cmpi eq, %1, %3 : vector<128x128xi32>
    %5 = vector.extract_strided_slice %0 {offsets = [0, 1], sizes = [128, 1], strides = [1, 1]} : vector<128x4xi32> to vector<128x1xi32>
    %6 = vector.broadcast %5 : vector<128x1xi32> to vector<128x128xi32>
    %7 = arith.cmpi eq, %1, %6 : vector<128x128xi32>
    %8 = arith.ori %4, %7 : vector<128x128xi1>
    %9 = vector.extract_strided_slice %0 {offsets = [0, 2], sizes = [128, 1], strides = [1, 1]} : vector<128x4xi32> to vector<128x1xi32>
    %10 = vector.broadcast %9 : vector<128x1xi32> to vector<128x128xi32>
    %11 = arith.cmpi eq, %1, %10 : vector<128x128xi32>
    %12 = arith.ori %8, %11 : vector<128x128xi1>
    %13 = vector.extract_strided_slice %0 {offsets = [0, 3], sizes = [128, 1], strides = [1, 1]} : vector<128x4xi32> to vector<128x1xi32>
    %14 = vector.broadcast %13 : vector<128x1xi32> to vector<128x128xi32>
    %15 = arith.cmpi eq, %1, %14 : vector<128x128xi32>
    %16 = arith.ori %12, %15 : vector<128x128xi1>
    %17 = arith.extui %16 : vector<128x128xi1> to vector<128x128xi32>
    %18 = arith.sitofp %17 : vector<128x128xi32> to vector<128x128xf32>
    %c0_1 = arith.constant 0 : index
    %c0_2 = arith.constant 0 : index
    %19 = vector.load %arg2[%c0_1, %c0_2] : memref<128x128xf32, #tpu.memory_space<vmem>>, vector<128x128xf32>
    %cst = arith.constant dense<0.000000e+00> : vector<128x128xf32>
    %20 = tpu.matmul %18, %19, %cst {dimension_numbers = #tpu.dot_dimension_numbers<[1], [0], [0], [1], [0, 0, 1, 1], [], []>} : vector<128x128xf32>, vector<128x128xf32>, vector<128x128xf32> -> vector<128x128xf32>
    %c0_3 = arith.constant 0 : index
    %c0_4 = arith.constant 0 : index
    %21 = vector.load %arg3[%c0_3, %c0_4] : memref<128x128xf32, #tpu.memory_space<vmem>>, vector<128x128xf32>
    tpu.vector_store %arg3[%c0_3, %c0_4], %20 {strides = array<i32>} : memref<128x128xf32, #tpu.memory_space<vmem>>, vector<128x128xf32>,
    return
  }
  func.func @transform_0(%arg0: i32) -> (i32, i32) {
    %c0_i32 = arith.constant 0 : i32
    %c0_i32_0 = arith.constant 0 : i32
    return %arg0, %c0_i32 : i32, i32
  }
  func.func @transform_1(%arg0: i32) -> (i32, i32) {
    %c0_i32 = arith.constant 0 : i32
    %c0_i32_0 = arith.constant 0 : i32
    %c0_i32_1 = arith.constant 0 : i32
    return %c0_i32, %c0_i32_0 : i32, i32
  }
  func.func @transform_2(%arg0: i32) -> (i32, i32) {
    %c0_i32 = arith.constant 0 : i32
    %c0_i32_0 = arith.constant 0 : i32
    return %arg0, %c0_i32 : i32, i32
  }
}

</mosaic_0001>

<bundles_post_ra>
// kernel: tpu_custom_call.1
= control target key start
LH: loop header
LB: loop body
LE: loop exit
PB: predicated region body
PF: predicated region fallthrough
CT: control target
= control target key end

     0   :  { %7 = vsyncpa [#allocation3], 0  ;;  %s1166_s0 = inlined_call_operand.vmem [shape: s32[16,4], index: 0, kind: input, shape index: {}]   ;;  %s1167_s1 = inlined_call_operand.hbm [shape: f32[128,128], index: 1, kind: input, shape index: {}]   ;;  %s1168_s2 = inlined_call_operand.hbm [shape: f32[16,128], index: 2, kind: output, shape index: {}]  }
   0x1   :  { %8 = vsyncpa [#allocation4], 0  ;;  %s826_s9 = smov [#allocation2]   ;;  %s778_s13 = scalar_lea.hbm %s1167_s1, 2048 }
   0x2   :  { %s16_s10 = sshll.u32 %s826_s9, 4  ;;  %p779_p0 = scmp.ne.s32.totalorder %s1167_s1, %s778_s13  ;;  %s17_s10 = int_to_ptr.vmem [resolvable:$true] %s16_s10 }
   0x3   :  { %p782_p1 = scmp.lt.u32.totalorder %s778_s13, %s1167_s1 }
   0x5   :  { %p784_p2 = pnand %p782_p1, %p779_p0 }
   0x7   :  { %787 = shalt.err (!%p784_p2)
}
   0x8   :  { %s788_s18 = scalar_lea.vmem %s17_s10, 2048  ;;  %p793_p4 = scmp.lt.s32.totalorder %s17_s10, %s17_s10 }
   0x9   :  { %p789_p3 = scmp.ne.s32.totalorder %s17_s10, %s788_s18  ;;  %p794_p5 = scmp.lt.s32.totalorder %s788_s18, %s788_s18 }
   0xb   :  { %p795_p6 = por %p794_p5, %p793_p4 }
   0xd   :  { %p796_p7 = pnand %p795_p6, %p789_p3 }
   0xf   :  { %799 = shalt.err (!%p796_p7)
}
  0x10   :  { %s827_s19 = smov 128   ;;  %s828_s20 = smov 8  }
  0x11   :  { %22 = dma.hbm_to_vmem [thread:$0]  %s1167_s1, 2048, %s17_s10, [#allocation3], %s827_s19, %s827_s19, %s828_s20  }
  0x12   :  { %822 = dma.done.wait [#allocation3], 2048  }
  0x13   :  { %823 = vsyncadd [#allocation3], 4294965248  ;;  %v829_v0 = vmov 1   ;;  %v830_v1 = vmov 0   ;;  %v870_v2 = vld [vmem:[%s1166_s0] sm:$0xff]  ;;  %v27_v4 = vld [vmem:[%s1166_s0 + $0x8] sm:$0xff]  ;;  %v42_v63 = vlaneseq }
  0x14   :  { %752 = vset.pattern.permute.xlu1 %v829_v0  ;;  %751 = vset.pattern.permute.xlu0 %v830_v1  ;;  %v877_v3 = vld [vmem:[%s1166_s0 + $0x40] sm:$0xff]  ;;  %v887_v5 = vld [vmem:[%s1166_s0 + $0x48] sm:$0xff]  ;;  %v894_v6 = vld [vmem:[%s1166_s0 + $0x50] sm:$0xff]  ;;  %v831_v9 = vmov 2   ;;  %v832_v13 = vmov 3  }
  0x15   :  { %109 = vperm.xlu1 %752, %v870_v2   ;;  %45 = vperm.xlu0 %751, %v870_v2   ;;  %v901_v7 = vld [vmem:[%s1166_s0 + $0x18] sm:$0xff]  ;;  %v908_v8 = vld [vmem:[%s1166_s0 + $0x60] sm:$0xff]  ;;  %v916_v10 = vld [vmem:[%s1166_s0 + $0x28] sm:$0xff] }
  0x16   :  { %v922_v11 = vld [vmem:[%s1166_s0 + $0x70] sm:$0xff]  ;;  %v929_v12 = vld [vmem:[%s1166_s0 + $0x38] sm:$0xff]  ;;  %v380_v15 = vld [vmem:[#allocation2] sm:$0xff] }
  0x17   :  { %v938_v14 = vld [vmem:[%s1166_s0 + $0x10] sm:$0xff]  ;;  %v381_v16 = vld [vmem:[#allocation2 + $0x8] sm:$0xff]  ;;  %v383_v19 = vld [vmem:[#allocation2 + $0x18] sm:$0xff] }
  0x18   :  { %v694_v17 = vpack.c.bf16 %v381_v16, %v380_v15  ;;  %v382_v18 = vld [vmem:[#allocation2 + $0x10] sm:$0xff]  ;;  %v384_v21 = vld [vmem:[#allocation2 + $0x20] sm:$0xff]  ;;  %v385_v22 = vld [vmem:[#allocation2 + $0x28] sm:$0xff] }
  0x19   :  { %133 = vperm.xlu1 %752, %v877_v3   ;;  %69 = vperm.xlu0 %751, %v877_v3   ;;  %v698_v20 = vpack.c.bf16 %v383_v19, %v382_v18  ;;  %v702_v23 = vpack.c.bf16 %v385_v22, %v384_v21  ;;  %v386_v24 = vld [vmem:[#allocation2 + $0x30] sm:$0xff]  ;;  %v387_v25 = vld [vmem:[#allocation2 + $0x38] sm:$0xff]  ;;  %v388_v28 = vld [vmem:[#allocation2 + $0x40] sm:$0xff]  ;;  %v1173_v18 = vmov 0 }
  0x1a   :  { %695 = vmatprep.subr.bf16.mxu0 %v694_v17  ;;  %726 = vmatprep.subr.bf16.mxu1 %v694_v17  ;;  %v37_v26 = vld [vmem:[%s1166_s0 + $0x58] sm:$0xff]  ;;  %v706_v27 = vpack.c.bf16 %v387_v25, %v386_v24  ;;  %v389_v29 = vld [vmem:[#allocation2 + $0x48] sm:$0xff]  ;;  %v390_v31 = vld [vmem:[#allocation2 + $0x50] sm:$0xff] }
  0x1b   :  { %697 = vmatpush3.bf16.msra.mxu0 %v694_v17  ;;  %734 = vmatpush3.bf16.msra.mxu1 %v694_v17  ;;  %v710_v30 = vpack.c.bf16 %v389_v29, %v388_v28  ;;  %v391_v32 = vld [vmem:[#allocation2 + $0x58] sm:$0xff]  ;;  %v392_v34 = vld [vmem:[#allocation2 + $0x60] sm:$0xff]  ;;  %v393_v35 = vld [vmem:[#allocation2 + $0x68] sm:$0xff] }
  0x1c   :  { %699 = vmatprep.subr.bf16.mxu0 %v698_v20  ;;  %727 = vmatprep.subr.bf16.mxu1 %v698_v20  ;;  %v714_v33 = vpack.c.bf16 %v391_v32, %v390_v31  ;;  %v718_v36 = vpack.c.bf16 %v393_v35, %v392_v34  ;;  %v394_v37 = vld [vmem:[#allocation2 + $0x70] sm:$0xff]  ;;  %v395_v38 = vld [vmem:[#allocation2 + $0x78] sm:$0xff]  ;;  %v30_v40 = vld [vmem:[%s1166_s0 + $0x20] sm:$0xff] }
  0x1d   :  { %753 = vset.pattern.permute.xlu1 %v830_v1  ;;  %48 = vperm.xlu0 %751, %v27_v4   ;;  %v722_v39 = vpack.c.bf16 %v395_v38, %v394_v37  ;;  %v39_v41 = vld [vmem:[%s1166_s0 + $0x68] sm:$0xff]  ;;  %v32_v42 = vld [vmem:[%s1166_s0 + $0x30] sm:$0xff]  ;;  %v41_v43 = vld [vmem:[%s1166_s0 + $0x78] sm:$0xff] }
  0x1e   :  { %72 = vperm.xlu1 %753, %v887_v5  }
  0x1f   :  { %701 = vmatpush3.bf16.msra.mxu0 %v698_v20  ;;  %735 = vmatpush3.bf16.msra.mxu1 %v698_v20  ;;  %v1175_v20 = vmov 0 }
  0x20   :  { %703 = vmatprep.subr.bf16.mxu0 %v702_v23  ;;  %728 = vmatprep.subr.bf16.mxu1 %v702_v23 }
  0x21   :  { %75 = vperm.xlu0 %751, %v894_v6  }
  0x22   :  { %754 = vset.pattern.permute.xlu1 %v829_v0 }
  0x23   :  { %136 = vperm.xlu1 %754, %v887_v5   ;;  %705 = vmatpush3.bf16.msra.mxu0 %v702_v23 }
  0x24   :  { %736 = vmatpush3.bf16.msra.mxu1 %v702_v23  ;;  %707 = vmatprep.subr.bf16.mxu0 %v706_v27 }
  0x25   :  { %54 = vperm.xlu0 %751, %v901_v7   ;;  %729 = vmatprep.subr.bf16.mxu1 %v706_v27 }
  0x27   :  { %755 = vset.pattern.permute.xlu1 %v831_v9  ;;  %709 = vmatpush3.bf16.msra.mxu0 %v706_v27 }
  0x28   :  { %189 = vperm.xlu1 %755, %v870_v2   ;;  %737 = vmatpush3.bf16.msra.mxu1 %v706_v27 }
  0x29   :  { %81 = vperm.xlu0 %751, %v908_v8   ;;  %711 = vmatprep.subr.bf16.mxu0 %v710_v30 }
  0x2a   :  { %730 = vmatprep.subr.bf16.mxu1 %v710_v30 }
  0x2b   :  { %713 = vmatpush3.bf16.msra.mxu0 %v710_v30 }
  0x2c   :  { %192 = vperm.xlu1 %755, %v27_v4   ;;  %738 = vmatpush3.bf16.msra.mxu1 %v710_v30 }
  0x2d   :  { %60 = vperm.xlu0 %751, %v916_v10   ;;  %715 = vmatprep.subr.bf16.mxu0 %v714_v33 }
  0x2e   :  { %731 = vmatprep.subr.bf16.mxu1 %v714_v33 }
  0x2f   :  { %717 = vmatpush3.bf16.msra.mxu0 %v714_v33 }
  0x30   :  { %216 = vperm.xlu1 %755, %v887_v5   ;;  %739 = vmatpush3.bf16.msra.mxu1 %v714_v33 }
  0x31   :  { %87 = vperm.xlu0 %751, %v922_v11   ;;  %719 = vmatprep.subr.bf16.mxu0 %v718_v36 }
  0x32   :  { %732 = vmatprep.subr.bf16.mxu1 %v718_v36 }
  0x33   :  { %721 = vmatpush3.bf16.msra.mxu0 %v718_v36 }
  0x34   :  { %756 = vset.pattern.permute.xlu1 %v832_v13  ;;  %740 = vmatpush3.bf16.msra.mxu1 %v718_v36 }
  0x35   :  { %293 = vperm.xlu1 %756, %v877_v3   ;;  %66 = vperm.xlu0 %751, %v929_v12  }
  0x36   :  { %723 = vmatprep.subr.bf16.mxu0 %v722_v39  ;;  %733 = vmatprep.subr.bf16.mxu1 %v722_v39 }
  0x37   :  { %725 = vmatpush3.bf16.msra.mxu0 %v722_v39 }
  0x38   :  { %741 = vmatpush3.bf16.msra.mxu1 %v722_v39 }
  0x39   :  { %272 = vperm.xlu1 %756, %v27_v4   ;;  %771 = vset.pattern.permute.xlu0 %v829_v0 }
  0x3a   :  { %112 = vperm.xlu0 %771, %v27_v4  }
  0x3d   :  { %757 = vset.pattern.permute.xlu1 %v830_v1 }
  0x3e   :  { %51 = vperm.xlu1 %757, %v938_v14   ;;  %118 = vperm.xlu0 %771, %v901_v7  }
  0x42   :  { %758 = vset.pattern.permute.xlu1 %v829_v0  ;;  %124 = vperm.xlu0 %771, %v916_v10  }
  0x43   :  { %115 = vperm.xlu1 %758, %v938_v14  }
  0x46   :  { %130 = vperm.xlu0 %771, %v929_v12  }
  0x47   :  { %139 = vperm.xlu1 %758, %v894_v6  }
  0x4a   :  { %773 = vset.pattern.permute.xlu0 %v831_v9 }
  0x4b   :  { %759 = vset.pattern.permute.xlu1 %v830_v1  ;;  %213 = vperm.xlu0 %773, %v877_v3   ;;  %v1015_v3 = vand.u32 127, %v42_v63 }
  0x4c   :  { %78 = vperm.xlu1 %759, %v37_v26  }
  0x4f   :  { %219 = vperm.xlu0 %773, %v894_v6  }
  0x50   :  { %760 = vset.pattern.permute.xlu1 %v829_v0 }
  0x51   :  { %142 = vperm.xlu1 %760, %v37_v26  }
  0x53   :  { %225 = vperm.xlu0 %773, %v908_v8  }
  0x55   :  { %761 = vset.pattern.permute.xlu1 %v831_v9 }
  0x56   :  { %195 = vperm.xlu1 %761, %v938_v14  }
  0x57   :  { %231 = vperm.xlu0 %773, %v922_v11  }
  0x5a   :  { %198 = vperm.xlu1 %761, %v901_v7  }
  0x5b   :  { %776 = vset.pattern.permute.xlu0 %v832_v13 }
  0x5c   :  { %269 = vperm.xlu0 %776, %v870_v2  }
  0x5e   :  { %222 = vperm.xlu1 %761, %v37_v26  }
  0x60   :  { %296 = vperm.xlu0 %776, %v887_v5   ;;  %v1169_v5 = vmov 0 }
  0x62   :  { %762 = vset.pattern.permute.xlu1 %v832_v13 }
  0x63   :  { %299 = vperm.xlu1 %762, %v894_v6  }
  0x64   :  { %275 = vperm.xlu0 %776, %v938_v14  }
  0x67   :  { %278 = vperm.xlu1 %762, %v901_v7  }
  0x68   :  { %302 = vperm.xlu0 %776, %v37_v26  }
  0x6b   :  { %763 = vset.pattern.permute.xlu1 %v830_v1 }
  0x6c   :  { %57 = vperm.xlu1 %763, %v30_v40   ;;  %281 = vperm.xlu0 %776, %v30_v40  }
  0x70   :  { %764 = vset.pattern.permute.xlu1 %v829_v0  ;;  %308 = vperm.xlu0 %776, %v39_v41  }
  0x71   :  { %121 = vperm.xlu1 %764, %v30_v40  }
  0x74   :  { %287 = vperm.xlu0 %776, %v32_v42  }
  0x75   :  { %145 = vperm.xlu1 %764, %v908_v8  }
  0x78   :  { %314 = vperm.xlu0 %776, %v41_v43  }
  0x79   :  { %765 = vset.pattern.permute.xlu1 %v830_v1 }
  0x7a   :  { %84 = vperm.xlu1 %765, %v39_v41  }
  0x7e   :  { %766 = vset.pattern.permute.xlu1 %v829_v0 }
  0x7f   :  { %148 = vperm.xlu1 %766, %v39_v41  }
  0x83   :  { %767 = vset.pattern.permute.xlu1 %v831_v9 }
  0x84   :  { %201 = vperm.xlu1 %767, %v30_v40  }
  0x88   :  { %204 = vperm.xlu1 %767, %v916_v10  }
  0x8c   :  { %228 = vperm.xlu1 %767, %v39_v41  }
  0x90   :  { %768 = vset.pattern.permute.xlu1 %v832_v13 }
  0x91   :  { %305 = vperm.xlu1 %768, %v908_v8   ;;  %v1171_v8 = vmov 0 }
  0x94   :  { %v989_v44 = vpop.permute.xlu1 %109  ;;  %v991_v45 = vpop.permute.xlu0 %45 }
  0x95   :  { %284 = vperm.xlu1 %768, %v916_v10   ;;  %vm156_vm15 = vcmp.eq.s32.totalorder %v1015_v3, %v989_v44 }
  0x98   :  { %v134_v46 = vpop.permute.xlu1 %133  ;;  %v70_v47 = vpop.permute.xlu0 %69 }
  0x99   :  { %769 = vset.pattern.permute.xlu1 %v830_v1  ;;  %vm164_vm6 = vcmp.eq.s32.totalorder %v1015_v3, %v134_v46  ;;  %vm100_vm7 = vcmp.eq.s32.totalorder %v1015_v3, %v70_v47 }
  0x9a   :  { %63 = vperm.xlu1 %769, %v32_v42   ;;  %vm180_vm8 = vmor %vm100_vm7, %vm164_vm6 }
  0x9c   :  { %v49_v48 = vpop.permute.xlu0 %48 }
  0x9d   :  { %v995_v49 = vpop.permute.xlu1 %72  ;;  %vm93_vm13 = vcmp.eq.s32.totalorder %v1015_v3, %v49_v48 }
  0x9e   :  { %770 = vset.pattern.permute.xlu1 %v829_v0  ;;  %vm101_vm6 = vcmp.eq.s32.totalorder %v1015_v3, %v995_v49 }
  0x9f   :  { %127 = vperm.xlu1 %770, %v32_v42  }
  0xa0   :  { %v998_v50 = vpop.permute.xlu0 %75 }
  0xa2   :  { %v1000_v51 = vpop.permute.xlu1 %136 }
  0xa3   :  { %151 = vperm.xlu1 %770, %v922_v11  }
  0xa4   :  { %v1003_v52 = vpop.permute.xlu0 %54 }
  0xa7   :  { %772 = vset.pattern.permute.xlu1 %v830_v1  ;;  %v1006_v53 = vpop.permute.xlu1 %189 }
  0xa8   :  { %90 = vperm.xlu1 %772, %v41_v43   ;;  %v1008_v54 = vpop.permute.xlu0 %81  ;;  %vm236_vm7 = vcmp.eq.s32.totalorder %v1015_v3, %v1006_v53 }
  0xab   :  { %v193_v55 = vpop.permute.xlu1 %192 }
  0xac   :  { %774 = vset.pattern.permute.xlu1 %v829_v0  ;;  %v61_v56 = vpop.permute.xlu0 %60 }
  0xad   :  { %154 = vperm.xlu1 %774, %v41_v43   ;;  %vm97_vm0 = vcmp.eq.s32.totalorder %v1015_v3, %v61_v56 }
  0xaf   :  { %v217_v57 = vpop.permute.xlu1 %216 }
  0xb0   :  { %v1011_v58 = vpop.permute.xlu0 %87 }
  0xb1   :  { %775 = vset.pattern.permute.xlu1 %v831_v9 }
  0xb2   :  { %207 = vperm.xlu1 %775, %v32_v42  }
  0xb4   :  { %v294_v59 = vpop.permute.xlu1 %293  ;;  %v67_v60 = vpop.permute.xlu0 %66 }
  0xb5   :  { %vm99_vm3 = vcmp.eq.s32.totalorder %v1015_v3, %v67_v60  ;;  %vm324_vm10 = vcmp.eq.s32.totalorder %v1015_v3, %v294_v59 }
  0xb6   :  { %210 = vperm.xlu1 %775, %v929_v12  }
  0xb8   :  { %v273_v61 = vpop.permute.xlu1 %272 }
  0xb9   :  { %v113_v62 = vpop.permute.xlu0 %112 }
  0xba   :  { %234 = vperm.xlu1 %775, %v41_v43   ;;  %vm157_vm14 = vcmp.eq.s32.totalorder %v1015_v3, %v113_v62 }
  0xbd   :  { %v52_v1 = vpop.permute.xlu1 %51  ;;  %v119_v2 = vpop.permute.xlu0 %118 }
  0xbe   :  { %777 = vset.pattern.permute.xlu1 %v832_v13 }
  0xbf   :  { %311 = vperm.xlu1 %777, %v922_v11   ;;  %v833_v11 = vmov 1.0  }
  0xc1   :  { %v125_v0 = vpop.permute.xlu0 %124 }
  0xc2   :  { %v116_v4 = vpop.permute.xlu1 %115  ;;  %vm161_vm1 = vcmp.eq.s32.totalorder %v1015_v3, %v125_v0 }
  0xc3   :  { %vm1021_vm2 = vmor %vm97_vm0, %vm161_vm1  ;;  %290 = vperm.xlu1 %777, %v929_v12   ;;  %vm92_vm0 = vcmp.eq.s32.totalorder %v1015_v3, %v991_v45  ;;  %vm165_vm1 = vcmp.eq.s32.totalorder %v1015_v3, %v1000_v51 }
  0xc4   :  { %v1170_v5 = vsel %vm1021_vm2, 4294967295, %v1169_v5 }
  0xc5   :  { %v131_v6 = vpop.permute.xlu0 %130 }
  0xc6   :  { %v140_v7 = vpop.permute.xlu1 %139  ;;  %vm163_vm4 = vcmp.eq.s32.totalorder %v1015_v3, %v131_v6 }
  0xc7   :  { %vm1028_vm5 = vmor %vm99_vm3, %vm163_vm4 }
  0xc8   :  { %v1172_v8 = vsel %vm1028_vm5, 4294967295, %v1171_v8  ;;  %vm173_vm3 = vmor %vm93_vm13, %vm157_vm14  ;;  %vm159_vm13 = vcmp.eq.s32.totalorder %v1015_v3, %v119_v2  ;;  %vm166_vm5 = vcmp.eq.s32.totalorder %v1015_v3, %v140_v7 }
  0xc9   :  { %vm172_vm4 = vmor %vm92_vm0, %vm156_vm15  ;;  %vm317_vm0 = vcmp.eq.s32.totalorder %v1015_v3, %v273_v61 }
  0xca   :  { %v214_v9 = vpop.permute.xlu0 %213  ;;  %vm252_vm14 = vmor %vm172_vm4, %vm236_vm7  ;;  %vm94_vm7 = vcmp.eq.s32.totalorder %v1015_v3, %v52_v1 }
  0xcb   :  { %vm244_vm9 = vcmp.eq.s32.totalorder %v1015_v3, %v214_v9  ;;  %v79_v10 = vpop.permute.xlu1 %78 }
  0xcc   :  { %vm260_vm11 = vmor %vm180_vm8, %vm244_vm9  ;;  %vm237_vm9 = vcmp.eq.s32.totalorder %v1015_v3, %v193_v55 }
  0xcd   :  { %vm340_vm12 = vmor %vm260_vm11, %vm324_vm10  ;;  %vm245_vm10 = vcmp.eq.s32.totalorder %v1015_v3, %v217_v57 }
  0xce   :  { %682 = vmatprep.mubr.msk.f32.mxu1 %vm340_vm12, %v833_v11  ;;  %v220_v12 = vpop.permute.xlu0 %219  ;;  %vm181_vm8 = vmor %vm101_vm6, %vm165_vm1  ;;  %vm95_vm12 = vcmp.eq.s32.totalorder %v1015_v3, %v1003_v52  ;;  %vm158_vm1 = vcmp.eq.s32.totalorder %v1015_v3, %v116_v4 }
  0xcf   :  { %vm253_vm11 = vmor %vm173_vm3, %vm237_vm9  ;;  %vm102_vm3 = vcmp.eq.s32.totalorder %v1015_v3, %v998_v50 }
  0xd0   :  { %v143_v13 = vpop.permute.xlu1 %142  ;;  %vm1058_vm15 = vmor %vm181_vm8, %vm245_vm10  ;;  %vm246_vm8 = vcmp.eq.s32.totalorder %v1015_v3, %v220_v12 }
  0xd1   :  { %v1174_v18 = vsel %vm1058_vm15, 4294967295, %v1173_v18  ;;  %vm333_vm6 = vmor %vm253_vm11, %vm317_vm0  ;;  %vm167_vm0 = vcmp.eq.s32.totalorder %v1015_v3, %v143_v13  ;;  %vm103_vm15 = vcmp.eq.s32.totalorder %v1015_v3, %v79_v10 }
  0xd2   :  { %v1039_v14 = vpop.permute.xlu0 %225  ;;  %vm1066_vm9 = vmor %vm95_vm12, %vm159_vm13 }
  0xd3   :  { %v1176_v20 = vsel %vm1066_vm9, 4294967295, %v1175_v20  ;;  %vm174_vm2 = vmor %vm94_vm7, %vm158_vm1 }
  0xd4   :  { %vm182_vm11 = vmor %vm102_vm3, %vm166_vm5 }
  0xd5   :  { %v196_v15 = vpop.permute.xlu1 %195  ;;  %vm262_vm12 = vmor %vm182_vm11, %vm246_vm8 }
  0xd6   :  { %v1051_v16 = vpop.permute.xlu0 %231  ;;  %vm238_vm13 = vcmp.eq.s32.totalorder %v1015_v3, %v196_v15  ;;  %vm1082_vm1 = vmor %vm103_vm15, %vm167_vm0  ;;  %vm1180_vm15 = vnez %v1176_v20 }
  0xd7   :  { %vm254_vm5 = vmor %vm174_vm2, %vm238_vm13 }
  0xd9   :  { %v199_v17 = vpop.permute.xlu1 %198 }
  0xdb   :  { %v270_v19 = vpop.permute.xlu0 %269 }
  0xdc   :  { %vm316_vm4 = vcmp.eq.s32.totalorder %v1015_v3, %v270_v19 }
  0xdd   :  { %v223_v21 = vpop.permute.xlu1 %222  ;;  %vm332_vm10 = vmor %vm252_vm14, %vm316_vm4  ;;  %vm1177_vm4 = vnez %v1174_v18 }
  0xde   :  { %670 = vmatprep.mubr.msk.f32.mxu0 %vm332_vm10, %v833_v11  ;;  %vm247_vm7 = vcmp.eq.s32.totalorder %v1015_v3, %v223_v21 }
  0xdf   :  { %671 = vmatmul.mubr.msk.f32.vlgmr.msra.gmra.mrb[0].mxu0 %vm333_vm6, %v833_v11  ;;  %v297_v22 = vpop.permute.xlu0 %296  ;;  %vm239_vm6 = vcmp.eq.s32.totalorder %v1015_v3, %v199_v17  ;;  %vm263_vm2 = vmor %vm1082_vm1, %vm247_vm7 }
  0xe0   :  { %vm325_vm9 = vcmp.eq.s32.totalorder %v1015_v3, %v297_v22 }
  0xe1   :  { %vm341_vm14 = vmor %vm1177_vm4, %vm325_vm9 }
  0xe2   :  { %v300_v24 = vpop.permute.xlu1 %299  ;;  %683 = vmatmul.mubr.msk.f32.vlgmr.msra.gmra.mrb[0].mxu1 %vm341_vm14, %v833_v11  ;;  %vm255_vm9 = vmor %vm1180_vm15, %vm239_vm6  ;;  %vm104_vm15 = vcmp.eq.s32.totalorder %v1015_v3, %v1008_v54 }
  0xe3   :  { %vm326_vm3 = vcmp.eq.s32.totalorder %v1015_v3, %v300_v24  ;;  %v276_v25 = vpop.permute.xlu0 %275 }
  0xe4   :  { %vm342_vm8 = vmor %vm262_vm12, %vm326_vm3  ;;  %vm318_vm10 = vcmp.eq.s32.totalorder %v1015_v3, %v276_v25 }
  0xe5   :  { %vm334_vm11 = vmor %vm254_vm5, %vm318_vm10  ;;  %685 = vmatprep.mubr.msk.f32.mxu1 %vm342_vm8, %v833_v11 }
  0xe6   :  { %v279_v26 = vpop.permute.xlu1 %278  ;;  %673 = vmatprep.mubr.msk.f32.mxu0 %vm334_vm11, %v833_v11 }
  0xe7   :  { %vm319_vm0 = vcmp.eq.s32.totalorder %v1015_v3, %v279_v26  ;;  %v303_v27 = vpop.permute.xlu0 %302 }
  0xe8   :  { %vm335_vm13 = vmor %vm255_vm9, %vm319_vm0  ;;  %vm327_vm12 = vcmp.eq.s32.totalorder %v1015_v3, %v303_v27 }
  0xe9   :  { %vm343_vm4 = vmor %vm263_vm2, %vm327_vm12  ;;  %674 = vmatmul.mubr.msk.f32.gmra.mrb[2].mxu0 %vm335_vm13, %v833_v11  ;;  %vm248_vm2 = vcmp.eq.s32.totalorder %v1015_v3, %v1039_v14 }
  0xea   :  { %686 = vmatmul.mubr.msk.f32.gmra.mrb[2].mxu1 %vm343_vm4, %v833_v11 }
  0xeb   :  { %v58_v28 = vpop.permute.xlu1 %57  ;;  %v282_v33 = vpop.permute.xlu0 %281 }
  0xec   :  { %vm96_vm1 = vcmp.eq.s32.totalorder %v1015_v3, %v58_v28  ;;  %vm320_vm5 = vcmp.eq.s32.totalorder %v1015_v3, %v282_v33 }
  0xef   :  { %v309_v37 = vpop.permute.xlu0 %308 }
  0xf0   :  { %v122_v29 = vpop.permute.xlu1 %121 }
  0xf1   :  { %vm160_vm14 = vcmp.eq.s32.totalorder %v1015_v3, %v122_v29 }
  0xf2   :  { %vm176_vm6 = vmor %vm96_vm1, %vm160_vm14  ;;  %vm329_vm14 = vcmp.eq.s32.totalorder %v1015_v3, %v309_v37 }
  0xf3   :  { %v288_v47 = vpop.permute.xlu0 %287 }
  0xf4   :  { %v146_v30 = vpop.permute.xlu1 %145 }
  0xf5   :  { %vm168_vm10 = vcmp.eq.s32.totalorder %v1015_v3, %v146_v30 }
  0xf6   :  { %vm184_vm0 = vmor %vm104_vm15, %vm168_vm10 }
  0xf7   :  { %vm264_vm1 = vmor %vm184_vm0, %vm248_vm2  ;;  %vm250_vm0 = vcmp.eq.s32.totalorder %v1015_v3, %v1051_v16  ;;  %v315_v50 = vpop.permute.xlu0 %314 }
  0xf9   :  { %v85_v31 = vpop.permute.xlu1 %84 }
  0xfa   :  { %vm105_vm13 = vcmp.eq.s32.totalorder %v1015_v3, %v85_v31 }
  0xfe   :  { %v149_v32 = vpop.permute.xlu1 %148 }
  0xff   :  { %vm169_vm11 = vcmp.eq.s32.totalorder %v1015_v3, %v149_v32 }
 0x100   :  { %vm185_vm12 = vmor %vm105_vm13, %vm169_vm11 }
 0x103   :  { %v202_v34 = vpop.permute.xlu1 %201 }
 0x104   :  { %vm240_vm3 = vcmp.eq.s32.totalorder %v1015_v3, %v202_v34 }
 0x105   :  { %vm256_vm7 = vmor %vm176_vm6, %vm240_vm3 }
 0x106   :  { %vm336_vm8 = vmor %vm256_vm7, %vm320_vm5 }
 0x107   :  { %v205_v35 = vpop.permute.xlu1 %204  ;;  %676 = vmatprep.mubr.msk.f32.mxu0 %vm336_vm8, %v833_v11  ;;  %vm1181_vm8 = vnez %v1170_v5 }
 0x108   :  { %vm241_vm6 = vcmp.eq.s32.totalorder %v1015_v3, %v205_v35 }
 0x109   :  { %vm257_vm10 = vmor %vm1181_vm8, %vm241_vm6  ;;  %vm322_vm6 = vcmp.eq.s32.totalorder %v1015_v3, %v288_v47 }
 0x10b   :  { %v229_v36 = vpop.permute.xlu1 %228 }
 0x10c   :  { %vm249_vm9 = vcmp.eq.s32.totalorder %v1015_v3, %v229_v36 }
 0x10d   :  { %vm265_vm4 = vmor %vm185_vm12, %vm249_vm9  ;;  %vm106_vm9 = vcmp.eq.s32.totalorder %v1015_v3, %v1011_v58 }
 0x10e   :  { %vm345_vm7 = vmor %vm265_vm4, %vm329_vm14 }
 0x110   :  { %v306_v38 = vpop.permute.xlu1 %305 }
 0x111   :  { %vm328_vm5 = vcmp.eq.s32.totalorder %v1015_v3, %v306_v38 }
 0x112   :  { %vm344_vm3 = vmor %vm264_vm1, %vm328_vm5 }
 0x113   :  { %688 = vmatprep.mubr.msk.f32.mxu1 %vm344_vm3, %v833_v11 }
 0x114   :  { %v285_v39 = vpop.permute.xlu1 %284  ;;  %689 = vmatmul.mubr.msk.f32.gmra.mrb[4].mxu1 %vm345_vm7, %v833_v11 }
 0x115   :  { %vm321_vm11 = vcmp.eq.s32.totalorder %v1015_v3, %v285_v39 }
 0x116   :  { %vm337_vm15 = vmor %vm257_vm10, %vm321_vm11 }
 0x117   :  { %677 = vmatmul.mubr.msk.f32.gmra.mrb[4].mxu0 %vm337_vm15, %v833_v11 }
 0x119   :  { %v64_v40 = vpop.permute.xlu1 %63 }
 0x11a   :  { %vm98_vm14 = vcmp.eq.s32.totalorder %v1015_v3, %v64_v40 }
 0x11e   :  { %v128_v41 = vpop.permute.xlu1 %127 }
 0x11f   :  { %vm162_vm4 = vcmp.eq.s32.totalorder %v1015_v3, %v128_v41 }
 0x120   :  { %vm178_vm1 = vmor %vm98_vm14, %vm162_vm4 }
 0x122   :  { %v152_v42 = vpop.permute.xlu1 %151 }
 0x123   :  { %vm170_vm2 = vcmp.eq.s32.totalorder %v1015_v3, %v152_v42 }
 0x124   :  { %vm186_vm13 = vmor %vm106_vm9, %vm170_vm2 }
 0x125   :  { %vm1128_vm12 = vmor %vm186_vm13, %vm250_vm0  ;;  %vm331_vm0 = vcmp.eq.s32.totalorder %v1015_v3, %v315_v50 }
 0x127   :  { %v91_v44 = vpop.permute.xlu1 %90 }
 0x128   :  { %vm107_vm11 = vcmp.eq.s32.totalorder %v1015_v3, %v91_v44 }
 0x12c   :  { %v155_v45 = vpop.permute.xlu1 %154 }
 0x12d   :  { %vm171_vm8 = vcmp.eq.s32.totalorder %v1015_v3, %v155_v45 }
 0x12e   :  { %vm187_vm15 = vmor %vm107_vm11, %vm171_vm8 }
 0x131   :  { %v208_v46 = vpop.permute.xlu1 %207 }
 0x132   :  { %vm242_vm5 = vcmp.eq.s32.totalorder %v1015_v3, %v208_v46 }
 0x133   :  { %vm258_vm3 = vmor %vm178_vm1, %vm242_vm5  ;;  %vm1184_vm1 = vnez %v1172_v8 }
 0x134   :  { %vm338_vm7 = vmor %vm258_vm3, %vm322_vm6 }
 0x135   :  { %v211_v48 = vpop.permute.xlu1 %210  ;;  %679 = vmatprep.mubr.msk.f32.mxu0 %vm338_vm7, %v833_v11 }
 0x136   :  { %vm243_vm13 = vcmp.eq.s32.totalorder %v1015_v3, %v211_v48 }
 0x137   :  { %vm259_vm5 = vmor %vm1184_vm1, %vm243_vm13 }
 0x139   :  { %v235_v49 = vpop.permute.xlu1 %234 }
 0x13a   :  { %vm251_vm10 = vcmp.eq.s32.totalorder %v1015_v3, %v235_v49 }
 0x13b   :  { %vm267_vm9 = vmor %vm187_vm15, %vm251_vm10 }
 0x13c   :  { %vm347_vm14 = vmor %vm267_vm9, %vm331_vm0 }
 0x13e   :  { %v312_v51 = vpop.permute.xlu1 %311 }
 0x13f   :  { %vm330_vm2 = vcmp.eq.s32.totalorder %v1015_v3, %v312_v51 }
 0x140   :  { %vm346_vm4 = vmor %vm1128_vm12, %vm330_vm2 }
 0x141   :  { %691 = vmatprep.mubr.msk.f32.mxu1 %vm346_vm4, %v833_v11 }
 0x142   :  { %v291_v52 = vpop.permute.xlu1 %290  ;;  %692 = vmatmul.mubr.msk.f32.gmra.mrb[6].mxu1 %vm347_vm14, %v833_v11 }
 0x143   :  { %vm323_vm6 = vcmp.eq.s32.totalorder %v1015_v3, %v291_v52 }
 0x144   :  { %vm339_vm3 = vmor %vm259_vm5, %vm323_vm6 }
 0x145   :  { %680 = vmatmul.mubr.msk.f32.gmra.mrb[6].mxu0 %vm339_vm3, %v833_v11 }
 0x1b2   :  { %v672_v53 = vpop.f32.mrb[0].mxu0 }
 0x1b3   :  { %542 = vst [vmem:[#allocation5 + $0x8] sm:$0xff] %v672_v53  ;;  %v462_v54 = vpop.f32.mrb[1].mxu0 }
 0x1b4   :  { %541 = vst [vmem:[#allocation5] sm:$0xff] %v462_v54 }
 0x1b5   :  { %v684_v55 = vpop.f32.mrb[0].mxu1 }
 0x1b6   :  { %550 = vst [vmem:[#allocation5 + $0x48] sm:$0xff] %v684_v55  ;;  %v502_v56 = vpop.f32.mrb[1].mxu1 }
 0x1b7   :  { %549 = vst [vmem:[#allocation5 + $0x40] sm:$0xff] %v502_v56 }
 0x1bc   :  { %v675_v57 = vpop.f32.mrb[2].mxu0 }
 0x1bd   :  { %544 = vst [vmem:[#allocation5 + $0x18] sm:$0xff] %v675_v57  ;;  %v472_v58 = vpop.f32.mrb[3].mxu0  ;;  %v687_v59 = vpop.f32.mrb[2].mxu1 }
 0x1be   :  { %543 = vst [vmem:[#allocation5 + $0x10] sm:$0xff] %v472_v58  ;;  %552 = vst [vmem:[#allocation5 + $0x58] sm:$0xff] %v687_v59  ;;  %v512_v60 = vpop.f32.mrb[3].mxu1 }
 0x1bf   :  { %551 = vst [vmem:[#allocation5 + $0x50] sm:$0xff] %v512_v60 }
 0x1e7   :  { %v690_v61 = vpop.f32.mrb[4].mxu1 }
 0x1e8   :  { %554 = vst [vmem:[#allocation5 + $0x68] sm:$0xff] %v690_v61  ;;  %v522_v62 = vpop.f32.mrb[5].mxu1 }
 0x1e9   :  { %553 = vst [vmem:[#allocation5 + $0x60] sm:$0xff] %v522_v62 }
 0x1ea   :  { %v678_v63 = vpop.f32.mrb[4].mxu0 }
 0x1eb   :  { %546 = vst [vmem:[#allocation5 + $0x28] sm:$0xff] %v678_v63  ;;  %v482_v1 = vpop.f32.mrb[5].mxu0 }
 0x1ec   :  { %545 = vst [vmem:[#allocation5 + $0x20] sm:$0xff] %v482_v1 }
 0x215   :  { %v693_v2 = vpop.f32.mrb[6].mxu1 }
 0x216   :  { %556 = vst [vmem:[#allocation5 + $0x78] sm:$0xff] %v693_v2  ;;  %v532_v3 = vpop.f32.mrb[7].mxu1 }
 0x217   :  { %555 = vst [vmem:[#allocation5 + $0x70] sm:$0xff] %v532_v3 }
 0x218   :  { %v681_v0 = vpop.f32.mrb[6].mxu0 }
 0x219   :  { %548 = vst [vmem:[#allocation5 + $0x38] sm:$0xff] %v681_v0  ;;  %v492_v4 = vpop.f32.mrb[7].mxu0 }
 0x21a   :  { %547 = vst [vmem:[#allocation5 + $0x30] sm:$0xff] %v492_v4 }
 0x21b   :  { %561 = vsyncadd [#allocation4], 1792  ;;  %s834_s0 = smov [#allocation5]  }
 0x21c   :  { %s562_s27 = sshll.u32 %s834_s0, 4  ;;  %s563_s27 = int_to_ptr.vmem [resolvable:$true] %s562_s27 }
 0x21d   :  { %s800_s28 = scalar_lea.vmem %s563_s27, 256  ;;  %s804_s29 = scalar_lea.vmem %s563_s27, 2048 }
 0x21e   :  { %p801_p8 = scmp.ne.s32.totalorder %s563_s27, %s800_s28  ;;  %p805_p9 = scmp.lt.s32.totalorder %s563_s27, %s563_s27 }
 0x21f   :  { %p806_p10 = scmp.lt.s32.totalorder %s804_s29, %s800_s28 }
 0x221   :  { %p807_p11 = por %p806_p10, %p805_p9 }
 0x223   :  { %p808_p12 = pnand %p807_p11, %p801_p8 }
 0x225   :  { %811 = shalt.err (!%p808_p12)
}
 0x226   :  { %s812_s4 = scalar_lea.hbm %s1168_s2, 256 }
 0x227   :  { %p813_p13 = scmp.ne.s32.totalorder %s1168_s2, %s812_s4  ;;  %p816_p0 = scmp.lt.u32.totalorder %s812_s4, %s1168_s2 }
 0x229   :  { %p818_p1 = pnand %p816_p0, %p813_p13 }
 0x22b   :  { %821 = shalt.err (!%p818_p1)
}
 0x22c   :  { %568 = dma.vmem_to_hbm [thread:$0]  %s563_s27, 256, %s1168_s2, [#allocation4], %s827_s19, %s827_s19, %s828_s20  }
 0x22d   :  { %824 = dma.done.wait [#allocation4], 2048  }
 0x22e   :  { %825 = vsyncadd [#allocation4], 4294965248 }
 0x22f   :  { %572 = vsyncpa [#allocation3], 1 }
 0x230   :  { %573 = vsyncpa [#allocation4], 1 }

</bundles_post_ra>
